<compile_context>
chip_gen: v6e
topology: v6e:2x2x1
jax: 0.10.0
libtpu: 0.0.40
codegen_flags: <defaults>
</compile_context>

<pallas_src>
import math
import functools

import jax
import jax.numpy as jnp
from jax.experimental import pallas as pl
from jax.experimental.pallas import tpu as pltpu


def _flash_attn_kernel(q_ref, kt_ref, v_ref, mask_ref,
                       wo_ref, bo_ref, lnw_ref, lnb_ref,
                       o_ref,
                       m_sc, l_sc, acc_sc,
                       *, num_heads, ln_eps, exp_bf16):
    ki = pl.program_id(2)
    nk = pl.num_programs(2)
    H = num_heads

    # ---- first key tile for this (b, q-tile): init online-softmax state ----
    @pl.when(ki == 0)
    def _init():
        m_sc[...] = jnp.full(m_sc.shape, -jnp.inf, m_sc.dtype)
        l_sc[...] = jnp.zeros(l_sc.shape, l_sc.dtype)
        acc_sc[...] = jnp.zeros(acc_sc.shape, acc_sc.dtype)

    q = q_ref[0]      # (H, tq, Dh) bf16, scale already folded in
    kt = kt_ref[0]    # (H, Dh, tk) bf16, pre-transposed (no in-kernel transpose)
    v = v_ref[0]      # (H, tk, Dh) bf16

    # ---- scores + online-softmax update (stats kept in f32) ----
    s = jnp.einsum('hqd,hdk->hqk', q, kt,
                   preferred_element_type=jnp.float32)            # (H, tq, tk)
    s = s + mask_ref[...]                                         # (1, 1, tk) bias

    m_prev = m_sc[...]
    m_new = jnp.maximum(m_prev, jnp.max(s, axis=-1, keepdims=True))
    alpha = jnp.exp(m_prev - m_new)                               # (H, tq, 1) f32
    if exp_bf16:
        # bf16 EUP path on v6e/v7x (~2x exp throughput); m/l math stays f32.
        p = jnp.exp((s - m_new).astype(jnp.bfloat16))             # bf16
        p_f32 = p.astype(jnp.float32)
    else:
        p_f32 = jnp.exp(s - m_new)
        p = p_f32.astype(jnp.bfloat16)

    l_sc[...] = alpha * l_sc[...] + jnp.sum(p_f32, axis=-1, keepdims=True)
    acc_sc[...] = alpha * acc_sc[...] + jnp.einsum(
        'hqk,hkd->hqd', p, v, preferred_element_type=jnp.float32)
    m_sc[...] = m_new

    # ---- last key tile: normalize, output projection, LayerNorm, write ----
    @pl.when(ki == nk - 1)
    def _finalize():
        # Exact reciprocal: runs once per q-tile, negligible cost, keeps the
        # normalization at f32 accuracy (review correctness concern).
        inv_l = pl.reciprocal(l_sc[...], approx=False)
        attn = (acc_sc[...] * inv_l).astype(jnp.bfloat16)         # (H, tq, Dh)

        tq = acc_sc.shape[1]
        E = wo_ref.shape[2]
        # Per-head accumulation into one (tq, E) f32 accumulator: avoids the
        # (H, tq, E) f32 intermediate + head-sum of the previous version.
        out = jnp.zeros((tq, E), jnp.float32)
        for h in range(H):                       # static unroll (H is small)
            out = out + jnp.dot(attn[h], wo_ref[h],
                                preferred_element_type=jnp.float32)
        out = out + bo_ref[...]

        # TODO(synk): attention_dropout with p>0 / training mode not implemented
        # (eval / p=0.0 identity semantics).
        mu = jnp.mean(out, axis=-1, keepdims=True)
        var = jnp.mean((out - mu) ** 2, axis=-1, keepdims=True)
        y = (out - mu) * jax.lax.rsqrt(var + ln_eps)
        o_ref[0] = (y * lnw_ref[...] + lnb_ref[...]).astype(o_ref.dtype)


def _pick_tiles(seq_len, device_kind):
    """Generation-aware tile sizes (v7x has 64 MiB VMEM/TC; v5e/v6e have 128)."""
    is_v7 = "v7" in device_kind
    tq_cands = (128,) if is_v7 else (256, 128)
    tk_cands = (256, 128) if is_v7 else (512, 256, 128)
    tq = next((t for t in tq_cands if seq_len % t == 0), seq_len)
    tk = next((t for t in tk_cands if seq_len % t == 0), seq_len)
    return tq, tk


def attention_forward(x, key_padding_mask, params, *, num_heads, ln_eps=1e-5):
    """x: (B, S, E) f32; key_padding_mask: (B, S) bool (True = padded) or None."""
    B, S, E = x.shape
    H = num_heads
    Dh = E // H
    scale = 1.0 / math.sqrt(Dh)

    if key_padding_mask is None:
        add_mask = jnp.zeros((B, 1, S), jnp.float32)
    else:
        add_mask = jnp.where(key_padding_mask, -1e9, 0.0).astype(jnp.float32)
        add_mask = add_mask.reshape(B, 1, S)

    # ---- QKV projection hoisted to the wrapper: one wide matmul, done once ----
    w_in = jnp.concatenate([params["wq"], params["wk"], params["wv"]], axis=0)  # (3E, E)
    b_in = jnp.concatenate([params["bq"], params["bk"], params["bv"]])          # (3E,)
    qkv = jnp.einsum('bse,fe->bsf', x, w_in) + b_in                             # (B, S, 3E)
    q, k, v = jnp.split(qkv, 3, axis=-1)

    # Head layouts for the kernel: q/v -> (B, H, S, Dh); k pre-transposed -> (B, H, Dh, S).
    q = (q.reshape(B, S, H, Dh).transpose(0, 2, 1, 3) * scale).astype(jnp.bfloat16)
    kt = k.reshape(B, S, H, Dh).transpose(0, 2, 3, 1).astype(jnp.bfloat16)
    v = v.reshape(B, S, H, Dh).transpose(0, 2, 1, 3).astype(jnp.bfloat16)

    # Output projection: y = attn_concat @ Wo^T + bo; head h owns rows h*Dh:(h+1)*Dh of Wo^T.
    wo_h = params["wo"].T.reshape(H, Dh, E).astype(jnp.bfloat16)                 # (H, Dh, E)
    bo = params["bo"].reshape(1, E).astype(jnp.float32)
    ln_w = params["ln_w"].reshape(1, E).astype(jnp.float32)
    ln_b = params["ln_b"].reshape(1, E).astype(jnp.float32)

    kind = jax.devices()[0].device_kind.lower()
    tq, tk = _pick_tiles(S, kind)
    exp_bf16 = ("v6" in kind) or ("v7" in kind)          # bf16 EUP path only there
    vmem_limit = (40 if "v7" in kind else 64) * 1024 * 1024

    grid = (B, S // tq, S // tk)

    kernel = functools.partial(_flash_attn_kernel, num_heads=H,
                               ln_eps=ln_eps, exp_bf16=exp_bf16)

    def const(shape):
        return pl.BlockSpec(shape, lambda b, qi, ki: tuple(0 for _ in shape))

    return pl.pallas_call(
        kernel,
        out_shape=jax.ShapeDtypeStruct((B, S, E), jnp.float32),
        grid_spec=pltpu.PrefetchScalarGridSpec(
            num_scalar_prefetch=0,
            grid=grid,
            in_specs=[
                pl.BlockSpec((1, H, tq, Dh), lambda b, qi, ki: (b, 0, qi, 0)),  # q
                pl.BlockSpec((1, H, Dh, tk), lambda b, qi, ki: (b, 0, 0, ki)),  # k^T
                pl.BlockSpec((1, H, tk, Dh), lambda b, qi, ki: (b, 0, ki, 0)),  # v
                pl.BlockSpec((1, 1, tk), lambda b, qi, ki: (b, 0, ki)),         # mask
                const((H, Dh, E)),   # wo per-head row blocks (resident in VMEM)
                const((1, E)),       # bo
                const((1, E)),       # ln_w
                const((1, E)),       # ln_b
            ],
            out_specs=pl.BlockSpec((1, tq, E), lambda b, qi, ki: (b, qi, 0)),
            scratch_shapes=[
                pltpu.VMEM((H, tq, 1), jnp.float32),    # running max m
                pltpu.VMEM((H, tq, 1), jnp.float32),    # running sum l
                pltpu.VMEM((H, tq, Dh), jnp.float32),   # attention accumulator
            ],
        ),
        compiler_params=pltpu.CompilerParams(
            dimension_semantics=("parallel", "parallel", "arbitrary"),
            vmem_limit_bytes=vmem_limit,
        ),
    )(q, kt, v, add_mask, wo_h, bo, ln_w, ln_b)


def init_params(key, embed_dim):
    ks = jax.random.split(key, 6)
    s = 1.0 / math.sqrt(embed_dim)
    # nn.MultiheadAttention packs in_proj_weight as (3E, E); split into q/k/v.
    in_proj_w = jax.random.uniform(ks[0], (3 * embed_dim, embed_dim),
                                   jnp.float32, -s, s)
    in_proj_b = jax.random.uniform(ks[1], (3 * embed_dim,), jnp.float32, -s, s)
    out_w = jax.random.uniform(ks[2], (embed_dim, embed_dim), jnp.float32, -s, s)
    out_b = jnp.zeros((embed_dim,), jnp.float32)
    return {
        "wq": in_proj_w[:embed_dim],
        "wk": in_proj_w[embed_dim:2 * embed_dim],
        "wv": in_proj_w[2 * embed_dim:],
        "bq": in_proj_b[:embed_dim],
        "bk": in_proj_b[embed_dim:2 * embed_dim],
        "bv": in_proj_b[2 * embed_dim:],
        "wo": out_w,
        "bo": out_b,
        "ln_w": jnp.ones((embed_dim,), jnp.float32),
        "ln_b": jnp.zeros((embed_dim,), jnp.float32),
    }


def _reference(x, key_padding_mask, params, num_heads, ln_eps=1e-5):
    B, S, E = x.shape
    H = num_heads
    Dh = E // H
    q = x @ params["wq"].T + params["bq"]
    k = x @ params["wk"].T + params["bk"]
    v = x @ params["wv"].T + params["bv"]
    q = q.reshape(B, S, H, Dh).transpose(0, 2, 1, 3) / math.sqrt(Dh)
    k = k.reshape(B, S, H, Dh).transpose(0, 2, 1, 3)
    v = v.reshape(B, S, H, Dh).transpose(0, 2, 1, 3)
    s = jnp.einsum('bhqd,bhkd->bhqk', q, k)
    if key_padding_mask is not None:
        s = s + jnp.where(key_padding_mask, -1e9, 0.0)[:, None, None, :]
    p = jax.nn.softmax(s, axis=-1)
    o = jnp.einsum('bhqk,bhkd->bhqd', p, v)
    o = o.transpose(0, 2, 1, 3).reshape(B, S, E)
    o = o @ params["wo"].T + params["bo"]
    mu = o.mean(-1, keepdims=True)
    var = ((o - mu) ** 2).mean(-1, keepdims=True)
    y = (o - mu) * jax.lax.rsqrt(var + ln_eps)
    return y * params["ln_w"] + params["ln_b"]


if __name__ == "__main__":
    B, S, E, H = 2, 8, 32, 4
    key = jax.random.PRNGKey(0)
    kx, kp = jax.random.split(key)
    x = jax.random.normal(kx, (B, S, E), jnp.float32)
    # batch 0: no padding; batch 1: last two positions padded
    key_padding_mask = jnp.array(
        [[False] * S,
         [False] * (S - 2) + [True, True]], dtype=jnp.bool_)

    params = init_params(kp, E)
    out = attention_forward(x, key_padding_mask, params, num_heads=H)
    jax.block_until_ready(out)

    assert out.shape == (B, S, E)
    assert bool(jnp.all(jnp.isfinite(out)))
    ref = _reference(x, key_padding_mask, params, num_heads=H)
    err = float(jnp.max(jnp.abs(out - ref)))
    assert err < 1e-1, f"max abs err vs reference: {err}"
    print("KERNEL_OK")
</pallas_src>

<mosaic_0001>
module attributes {stable_mosaic.version = 11 : i64} {
  func.func @_flash_attn_kernel(%arg0: i32, %arg1: i32, %arg2: i32, %arg3: memref<1x4x8x8xbf16, #tpu.memory_space<vmem>>, %arg4: memref<1x4x8x8xbf16, #tpu.memory_space<vmem>>, %arg5: memref<1x4x8x8xbf16, #tpu.memory_space<vmem>>, %arg6: memref<1x1x8xf32, #tpu.memory_space<vmem>>, %arg7: memref<4x8x32xbf16, #tpu.memory_space<vmem>>, %arg8: memref<1x32xf32, #tpu.memory_space<vmem>>, %arg9: memref<1x32xf32, #tpu.memory_space<vmem>>, %arg10: memref<1x32xf32, #tpu.memory_space<vmem>>, %arg11: memref<1x8x32xf32, #tpu.memory_space<vmem>>, %arg12: memref<4x8x1xf32, #tpu.memory_space<vmem>>, %arg13: memref<4x8x1xf32, #tpu.memory_space<vmem>>, %arg14: memref<4x8x8xf32, #tpu.memory_space<vmem>>) attributes {dimension_semantics = [#tpu.dimension_semantics<parallel>, #tpu.dimension_semantics<parallel>, #tpu.dimension_semantics<arbitrary>], iteration_bounds = array<i64: 2, 1, 1>, scalar_prefetch = 0 : i64, scratch_operands = 3 : i64, tpu.core_type = #tpu.core_type<tc>, window_params = [{transform_indices = @transform_0, window_bounds = array<i64: 1, 4, 8, 8>}, {transform_indices = @transform_1, window_bounds = array<i64: 1, 4, 8, 8>}, {transform_indices = @transform_2, window_bounds = array<i64: 1, 4, 8, 8>}, {transform_indices = @transform_3, window_bounds = array<i64: 1, 1, 8>}, {pipeline_mode = #tpu.pipeline_mode<synchronous>, transform_indices = @transform_4, window_bounds = array<i64: 4, 8, 32>}, {pipeline_mode = #tpu.pipeline_mode<synchronous>, transform_indices = @transform_5, window_bounds = array<i64: 1, 32>}, {pipeline_mode = #tpu.pipeline_mode<synchronous>, transform_indices = @transform_6, window_bounds = array<i64: 1, 32>}, {pipeline_mode = #tpu.pipeline_mode<synchronous>, transform_indices = @transform_7, window_bounds = array<i64: 1, 32>}, {transform_indices = @transform_8, window_bounds = array<i64: 1, 8, 32>}]} {
    %c0_i32 = arith.constant 0 : i32
    %0 = arith.cmpi eq, %arg2, %c0_i32 : i32
    %1 = arith.extui %0 : i1 to i32
    %c0_i32_0 = arith.constant 0 : i32
    %2 = arith.cmpi ne, %1, %c0_i32_0 : i32
    scf.if %2 {
      %cst_38 = arith.constant 0xFF800000 : f32
      %39 = vector.broadcast %cst_38 : f32 to vector<4x8x1xf32>
      %c0_39 = arith.constant 0 : index
      %c0_40 = arith.constant 0 : index
      %c0_41 = arith.constant 0 : index
      %40 = vector.load %arg12[%c0_39, %c0_40, %c0_41] : memref<4x8x1xf32, #tpu.memory_space<vmem>>, vector<4x8x1xf32>
      tpu.vector_store %arg12[%c0_39, %c0_40, %c0_41], %39 {strides = array<i32>} : memref<4x8x1xf32, #tpu.memory_space<vmem>>, vector<4x8x1xf32>,
      %cst_42 = arith.constant 0.000000e+00 : f32
      %41 = vector.broadcast %cst_42 : f32 to vector<4x8x1xf32>
      %c0_43 = arith.constant 0 : index
      %c0_44 = arith.constant 0 : index
      %c0_45 = arith.constant 0 : index
      %42 = vector.load %arg13[%c0_43, %c0_44, %c0_45] : memref<4x8x1xf32, #tpu.memory_space<vmem>>, vector<4x8x1xf32>
      tpu.vector_store %arg13[%c0_43, %c0_44, %c0_45], %41 {strides = array<i32>} : memref<4x8x1xf32, #tpu.memory_space<vmem>>, vector<4x8x1xf32>,
      %cst_46 = arith.constant 0.000000e+00 : f32
      %43 = vector.broadcast %cst_46 : f32 to vector<4x8x8xf32>
      %c0_47 = arith.constant 0 : index
      %c0_48 = arith.constant 0 : index
      %c0_49 = arith.constant 0 : index
      %44 = vector.load %arg14[%c0_47, %c0_48, %c0_49] : memref<4x8x8xf32, #tpu.memory_space<vmem>>, vector<4x8x8xf32>
      tpu.vector_store %arg14[%c0_47, %c0_48, %c0_49], %43 {strides = array<i32>} : memref<4x8x8xf32, #tpu.memory_space<vmem>>, vector<4x8x8xf32>,
    } else {
    }
    %c0 = arith.constant 0 : index
    %c0_1 = arith.constant 0 : index
    %c0_2 = arith.constant 0 : index
    %c0_3 = arith.constant 0 : index
    %3 = vector.load %arg3[%c0, %c0_1, %c0_2, %c0_3] : memref<1x4x8x8xbf16, #tpu.memory_space<vmem>>, vector<1x4x8x8xbf16>
    %4 = vector.shape_cast %3 : vector<1x4x8x8xbf16> to vector<4x8x8xbf16>
    %c0_4 = arith.constant 0 : index
    %c0_5 = arith.constant 0 : index
    %c0_6 = arith.constant 0 : index
    %c0_7 = arith.constant 0 : index
    %5 = vector.load %arg4[%c0_4, %c0_5, %c0_6, %c0_7] : memref<1x4x8x8xbf16, #tpu.memory_space<vmem>>, vector<1x4x8x8xbf16>
    %6 = vector.shape_cast %5 : vector<1x4x8x8xbf16> to vector<4x8x8xbf16>
    %c0_8 = arith.constant 0 : index
    %c0_9 = arith.constant 0 : index
    %c0_10 = arith.constant 0 : index
    %c0_11 = arith.constant 0 : index
    %7 = vector.load %arg5[%c0_8, %c0_9, %c0_10, %c0_11] : memref<1x4x8x8xbf16, #tpu.memory_space<vmem>>, vector<1x4x8x8xbf16>
    %8 = vector.shape_cast %7 : vector<1x4x8x8xbf16> to vector<4x8x8xbf16>
    "tpu.trace_start"() <{level = 10 : i32, message = "hqd,hdk->hqk"}> : () -> ()
    %cst = arith.constant dense<0.000000e+00> : vector<4x8x8xf32>
    %9 = tpu.matmul %4, %6, %cst {dimension_numbers = #tpu.dot_dimension_numbers<[2], [1], [1], [2], [0, 0, 0, 1, 1, 2], [0], [0]>} : vector<4x8x8xbf16>, vector<4x8x8xbf16>, vector<4x8x8xf32> -> vector<4x8x8xf32>
    "tpu.trace_stop"() : () -> ()
    %c0_12 = arith.constant 0 : index
    %c0_13 = arith.constant 0 : index
    %c0_14 = arith.constant 0 : index
    %10 = vector.load %arg6[%c0_12, %c0_13, %c0_14] : memref<1x1x8xf32, #tpu.memory_space<vmem>>, vector<1x1x8xf32>
    %11 = vector.broadcast %10 : vector<1x1x8xf32> to vector<4x8x8xf32>
    %12 = arith.addf %9, %11 : vector<4x8x8xf32>
    %c0_15 = arith.constant 0 : index
    %c0_16 = arith.constant 0 : index
    %c0_17 = arith.constant 0 : index
    %13 = vector.load %arg12[%c0_15, %c0_16, %c0_17] : memref<4x8x1xf32, #tpu.memory_space<vmem>>, vector<4x8x1xf32>
    %cst_18 = arith.constant dense<0xFF800000> : vector<4x8xf32>
    %14 = vector.multi_reduction <maximumf>, %12, %cst_18 [2] : vector<4x8x8xf32> to vector<4x8xf32>
    %15 = vector.shape_cast %14 : vector<4x8xf32> to vector<4x8x1xf32>
    %16 = arith.maximumf %13, %15 : vector<4x8x1xf32>
    %17 = arith.subf %13, %16 : vector<4x8x1xf32>
    %18 = math.exp %17 : vector<4x8x1xf32>
    %19 = vector.broadcast %16 : vector<4x8x1xf32> to vector<4x8x8xf32>
    %20 = arith.subf %12, %19 : vector<4x8x8xf32>
    %21 = math.exp %20 : vector<4x8x8xf32>
    %22 = arith.truncf %21 : vector<4x8x8xf32> to vector<4x8x8xbf16>
    %c0_19 = arith.constant 0 : index
    %c0_20 = arith.constant 0 : index
    %c0_21 = arith.constant 0 : index
    %23 = vector.load %arg13[%c0_19, %c0_20, %c0_21] : memref<4x8x1xf32, #tpu.memory_space<vmem>>, vector<4x8x1xf32>
    %24 = arith.mulf %18, %23 : vector<4x8x1xf32>
    %cst_22 = arith.constant dense<0.000000e+00> : vector<4x8xf32>
    %25 = vector.multi_reduction <add>, %21, %cst_22 [2] : vector<4x8x8xf32> to vector<4x8xf32>
    %26 = vector.shape_cast %25 : vector<4x8xf32> to vector<4x8x1xf32>
    %27 = arith.addf %24, %26 : vector<4x8x1xf32>
    %c0_23 = arith.constant 0 : index
    %c0_24 = arith.constant 0 : index
    %c0_25 = arith.constant 0 : index
    %28 = vector.load %arg13[%c0_23, %c0_24, %c0_25] : memref<4x8x1xf32, #tpu.memory_space<vmem>>, vector<4x8x1xf32>
    tpu.vector_store %arg13[%c0_23, %c0_24, %c0_25], %27 {strides = array<i32>} : memref<4x8x1xf32, #tpu.memory_space<vmem>>, vector<4x8x1xf32>,
    %c0_26 = arith.constant 0 : index
    %c0_27 = arith.constant 0 : index
    %c0_28 = arith.constant 0 : index
    %29 = vector.load %arg14[%c0_26, %c0_27, %c0_28] : memref<4x8x8xf32, #tpu.memory_space<vmem>>, vector<4x8x8xf32>
    %30 = vector.broadcast %18 : vector<4x8x1xf32> to vector<4x8x8xf32>
    %31 = arith.mulf %30, %29 : vector<4x8x8xf32>
    "tpu.trace_start"() <{level = 10 : i32, message = "hqk,hkd->hqd"}> : () -> ()
    %cst_29 = arith.constant dense<0.000000e+00> : vector<4x8x8xf32>
    %32 = tpu.matmul %22, %8, %cst_29 {dimension_numbers = #tpu.dot_dimension_numbers<[2], [1], [1], [2], [0, 0, 0, 1, 1, 2], [0], [0]>} : vector<4x8x8xbf16>, vector<4x8x8xbf16>, vector<4x8x8xf32> -> vector<4x8x8xf32>
    "tpu.trace_stop"() : () -> ()
    %33 = arith.addf %31, %32 : vector<4x8x8xf32>
    %c0_30 = arith.constant 0 : index
    %c0_31 = arith.constant 0 : index
    %c0_32 = arith.constant 0 : index
    %34 = vector.load %arg14[%c0_30, %c0_31, %c0_32] : memref<4x8x8xf32, #tpu.memory_space<vmem>>, vector<4x8x8xf32>
    tpu.vector_store %arg14[%c0_30, %c0_31, %c0_32], %33 {strides = array<i32>} : memref<4x8x8xf32, #tpu.memory_space<vmem>>, vector<4x8x8xf32>,
    %c0_33 = arith.constant 0 : index
    %c0_34 = arith.constant 0 : index
    %c0_35 = arith.constant 0 : index
    %35 = vector.load %arg12[%c0_33, %c0_34, %c0_35] : memref<4x8x1xf32, #tpu.memory_space<vmem>>, vector<4x8x1xf32>
    tpu.vector_store %arg12[%c0_33, %c0_34, %c0_35], %16 {strides = array<i32>} : memref<4x8x1xf32, #tpu.memory_space<vmem>>, vector<4x8x1xf32>,
    %c0_i32_36 = arith.constant 0 : i32
    %36 = arith.cmpi eq, %arg2, %c0_i32_36 : i32
    %37 = arith.extui %36 : i1 to i32
    %c0_i32_37 = arith.constant 0 : i32
    %38 = arith.cmpi ne, %37, %c0_i32_37 : i32
    scf.if %38 {
      %c0_38 = arith.constant 0 : index
      %c0_39 = arith.constant 0 : index
      %c0_40 = arith.constant 0 : index
      %39 = vector.load %arg13[%c0_38, %c0_39, %c0_40] : memref<4x8x1xf32, #tpu.memory_space<vmem>>, vector<4x8x1xf32>
      %40 = tpu.reciprocal %39 : vector<4x8x1xf32> -> vector<4x8x1xf32>
      %c0_41 = arith.constant 0 : index
      %c0_42 = arith.constant 0 : index
      %c0_43 = arith.constant 0 : index
      %41 = vector.load %arg14[%c0_41, %c0_42, %c0_43] : memref<4x8x8xf32, #tpu.memory_space<vmem>>, vector<4x8x8xf32>
      %42 = vector.broadcast %40 : vector<4x8x1xf32> to vector<4x8x8xf32>
      %43 = arith.mulf %41, %42 : vector<4x8x8xf32>
      %44 = arith.truncf %43 : vector<4x8x8xf32> to vector<4x8x8xbf16>
      %cst_44 = arith.constant 0.000000e+00 : f32
      %45 = vector.broadcast %cst_44 : f32 to vector<8x32xf32>
      %46 = vector.extract_strided_slice %44 {offsets = [0, 0, 0], sizes = [1, 8, 8], strides = [1, 1, 1]} : vector<4x8x8xbf16> to vector<1x8x8xbf16>
      %47 = vector.shape_cast %46 : vector<1x8x8xbf16> to vector<8x8xbf16>
      %c0_45 = arith.constant 0 : index
      %c0_46 = arith.constant 0 : index
      %c0_47 = arith.constant 0 : index
      %48 = vector.load %arg7[%c0_45, %c0_46, %c0_47] : memref<4x8x32xbf16, #tpu.memory_space<vmem>>, vector<1x8x32xbf16>
      %49 = vector.shape_cast %48 : vector<1x8x32xbf16> to vector<8x32xbf16>
      %cst_48 = arith.constant dense<0.000000e+00> : vector<8x32xf32>
      %50 = tpu.matmul %47, %49, %cst_48 {dimension_numbers = #tpu.dot_dimension_numbers<[1], [0], [0], [1], [0, 0, 1, 1], [], []>} : vector<8x8xbf16>, vector<8x32xbf16>, vector<8x32xf32> -> vector<8x32xf32>
      %51 = arith.addf %45, %50 : vector<8x32xf32>
      %52 = vector.extract_strided_slice %44 {offsets = [1, 0, 0], sizes = [1, 8, 8], strides = [1, 1, 1]} : vector<4x8x8xbf16> to vector<1x8x8xbf16>
      %53 = vector.shape_cast %52 : vector<1x8x8xbf16> to vector<8x8xbf16>
      %c1 = arith.constant 1 : index
      %c0_49 = arith.constant 0 : index
      %c0_50 = arith.constant 0 : index
      %54 = vector.load %arg7[%c1, %c0_49, %c0_50] : memref<4x8x32xbf16, #tpu.memory_space<vmem>>, vector<1x8x32xbf16>
      %55 = vector.shape_cast %54 : vector<1x8x32xbf16> to vector<8x32xbf16>
      %cst_51 = arith.constant dense<0.000000e+00> : vector<8x32xf32>
      %56 = tpu.matmul %53, %55, %cst_51 {dimension_numbers = #tpu.dot_dimension_numbers<[1], [0], [0], [1], [0, 0, 1, 1], [], []>} : vector<8x8xbf16>, vector<8x32xbf16>, vector<8x32xf32> -> vector<8x32xf32>
      %57 = arith.addf %51, %56 : vector<8x32xf32>
      %58 = vector.extract_strided_slice %44 {offsets = [2, 0, 0], sizes = [1, 8, 8], strides = [1, 1, 1]} : vector<4x8x8xbf16> to vector<1x8x8xbf16>
      %59 = vector.shape_cast %58 : vector<1x8x8xbf16> to vector<8x8xbf16>
      %c2 = arith.constant 2 : index
      %c0_52 = arith.constant 0 : index
      %c0_53 = arith.constant 0 : index
      %60 = vector.load %arg7[%c2, %c0_52, %c0_53] : memref<4x8x32xbf16, #tpu.memory_space<vmem>>, vector<1x8x32xbf16>
      %61 = vector.shape_cast %60 : vector<1x8x32xbf16> to vector<8x32xbf16>
      %cst_54 = arith.constant dense<0.000000e+00> : vector<8x32xf32>
      %62 = tpu.matmul %59, %61, %cst_54 {dimension_numbers = #tpu.dot_dimension_numbers<[1], [0], [0], [1], [0, 0, 1, 1], [], []>} : vector<8x8xbf16>, vector<8x32xbf16>, vector<8x32xf32> -> vector<8x32xf32>
      %63 = arith.addf %57, %62 : vector<8x32xf32>
      %64 = vector.extract_strided_slice %44 {offsets = [3, 0, 0], sizes = [1, 8, 8], strides = [1, 1, 1]} : vector<4x8x8xbf16> to vector<1x8x8xbf16>
      %65 = vector.shape_cast %64 : vector<1x8x8xbf16> to vector<8x8xbf16>
      %c3 = arith.constant 3 : index
      %c0_55 = arith.constant 0 : index
      %c0_56 = arith.constant 0 : index
      %66 = vector.load %arg7[%c3, %c0_55, %c0_56] : memref<4x8x32xbf16, #tpu.memory_space<vmem>>, vector<1x8x32xbf16>
      %67 = vector.shape_cast %66 : vector<1x8x32xbf16> to vector<8x32xbf16>
      %cst_57 = arith.constant dense<0.000000e+00> : vector<8x32xf32>
      %68 = tpu.matmul %65, %67, %cst_57 {dimension_numbers = #tpu.dot_dimension_numbers<[1], [0], [0], [1], [0, 0, 1, 1], [], []>} : vector<8x8xbf16>, vector<8x32xbf16>, vector<8x32xf32> -> vector<8x32xf32>
      %69 = arith.addf %63, %68 : vector<8x32xf32>
      %c0_58 = arith.constant 0 : index
      %c0_59 = arith.constant 0 : index
      %70 = vector.load %arg8[%c0_58, %c0_59] : memref<1x32xf32, #tpu.memory_space<vmem>>, vector<1x32xf32>
      %71 = vector.broadcast %70 : vector<1x32xf32> to vector<8x32xf32>
      %72 = arith.addf %69, %71 : vector<8x32xf32>
      %cst_60 = arith.constant dense<0.000000e+00> : vector<8xf32>
      %73 = vector.multi_reduction <add>, %72, %cst_60 [1] : vector<8x32xf32> to vector<8xf32>
      %74 = vector.shape_cast %73 : vector<8xf32> to vector<8x1xf32>
      %cst_61 = arith.constant 3.200000e+01 : f32
      %75 = vector.broadcast %cst_61 : f32 to vector<8x1xf32>
      %76 = arith.divf %74, %75 : vector<8x1xf32>
      %77 = vector.broadcast %76 : vector<8x1xf32> to vector<8x32xf32>
      %78 = arith.subf %72, %77 : vector<8x32xf32>
      %79 = arith.mulf %78, %78 : vector<8x32xf32>
      %cst_62 = arith.constant dense<0.000000e+00> : vector<8xf32>
      %80 = vector.multi_reduction <add>, %79, %cst_62 [1] : vector<8x32xf32> to vector<8xf32>
      %81 = vector.shape_cast %80 : vector<8xf32> to vector<8x1xf32>
      %cst_63 = arith.constant 3.200000e+01 : f32
      %82 = vector.broadcast %cst_63 : f32 to vector<8x1xf32>
      %83 = arith.divf %81, %82 : vector<8x1xf32>
      %84 = vector.broadcast %76 : vector<8x1xf32> to vector<8x32xf32>
      %85 = arith.subf %72, %84 : vector<8x32xf32>
      %cst_64 = arith.constant 9.99999974E-6 : f32
      %86 = vector.broadcast %cst_64 : f32 to vector<8x1xf32>
      %87 = arith.addf %83, %86 : vector<8x1xf32>
      %88 = math.rsqrt %87 : vector<8x1xf32>
      %89 = vector.broadcast %88 : vector<8x1xf32> to vector<8x32xf32>
      %90 = arith.mulf %85, %89 : vector<8x32xf32>
      %c0_65 = arith.constant 0 : index
      %c0_66 = arith.constant 0 : index
      %91 = vector.load %arg9[%c0_65, %c0_66] : memref<1x32xf32, #tpu.memory_space<vmem>>, vector<1x32xf32>
      %92 = vector.broadcast %91 : vector<1x32xf32> to vector<8x32xf32>
      %93 = arith.mulf %90, %92 : vector<8x32xf32>
      %c0_67 = arith.constant 0 : index
      %c0_68 = arith.constant 0 : index
      %94 = vector.load %arg10[%c0_67, %c0_68] : memref<1x32xf32, #tpu.memory_space<vmem>>, vector<1x32xf32>
      %95 = vector.broadcast %94 : vector<1x32xf32> to vector<8x32xf32>
      %96 = arith.addf %93, %95 : vector<8x32xf32>
      %c0_69 = arith.constant 0 : index
      %c0_70 = arith.constant 0 : index
      %c0_71 = arith.constant 0 : index
      %97 = vector.load %arg11[%c0_69, %c0_70, %c0_71] : memref<1x8x32xf32, #tpu.memory_space<vmem>>, vector<1x8x32xf32>
      %98 = vector.shape_cast %97 : vector<1x8x32xf32> to vector<8x32xf32>
      %99 = vector.shape_cast %96 : vector<8x32xf32> to vector<1x8x32xf32>
      tpu.vector_store %arg11[%c0_69, %c0_70, %c0_71], %99 {strides = array<i32>} : memref<1x8x32xf32, #tpu.memory_space<vmem>>, vector<1x8x32xf32>,
    } else {
    }
    return
  }
  func.func @transform_0(%arg0: i32, %arg1: i32, %arg2: i32) -> (i32, i32, i32, i32) {
    %c0_i32 = arith.constant 0 : i32
    %c0_i32_0 = arith.constant 0 : i32
    %c0_i32_1 = arith.constant 0 : i32
    return %arg0, %c0_i32, %arg1, %c0_i32_0 : i32, i32, i32, i32
  }
  func.func @transform_1(%arg0: i32, %arg1: i32, %arg2: i32) -> (i32, i32, i32, i32) {
    %c0_i32 = arith.constant 0 : i32
    %c0_i32_0 = arith.constant 0 : i32
    %c0_i32_1 = arith.constant 0 : i32
    return %arg0, %c0_i32, %c0_i32_0, %arg2 : i32, i32, i32, i32
  }
  func.func @transform_2(%arg0: i32, %arg1: i32, %arg2: i32) -> (i32, i32, i32, i32) {
    %c0_i32 = arith.constant 0 : i32
    %c0_i32_0 = arith.constant 0 : i32
    %c0_i32_1 = arith.constant 0 : i32
    return %arg0, %c0_i32, %arg2, %c0_i32_0 : i32, i32, i32, i32
  }
  func.func @transform_3(%arg0: i32, %arg1: i32, %arg2: i32) -> (i32, i32, i32) {
    %c0_i32 = arith.constant 0 : i32
    %c0_i32_0 = arith.constant 0 : i32
    return %arg0, %c0_i32, %arg2 : i32, i32, i32
  }
  func.func @transform_4(%arg0: i32, %arg1: i32, %arg2: i32) -> (i32, i32, i32) {
    %c0_i32 = arith.constant 0 : i32
    %c0_i32_0 = arith.constant 0 : i32
    %c0_i32_1 = arith.constant 0 : i32
    %c0_i32_2 = arith.constant 0 : i32
    return %c0_i32, %c0_i32_0, %c0_i32_1 : i32, i32, i32
  }
  func.func @transform_5(%arg0: i32, %arg1: i32, %arg2: i32) -> (i32, i32) {
    %c0_i32 = arith.constant 0 : i32
    %c0_i32_0 = arith.constant 0 : i32
    %c0_i32_1 = arith.constant 0 : i32
    return %c0_i32, %c0_i32_0 : i32, i32
  }
  func.func @transform_6(%arg0: i32, %arg1: i32, %arg2: i32) -> (i32, i32) {
    %c0_i32 = arith.constant 0 : i32
    %c0_i32_0 = arith.constant 0 : i32
    %c0_i32_1 = arith.constant 0 : i32
    return %c0_i32, %c0_i32_0 : i32, i32
  }
  func.func @transform_7(%arg0: i32, %arg1: i32, %arg2: i32) -> (i32, i32) {
    %c0_i32 = arith.constant 0 : i32
    %c0_i32_0 = arith.constant 0 : i32
    %c0_i32_1 = arith.constant 0 : i32
    return %c0_i32, %c0_i32_0 : i32, i32
  }
  func.func @transform_8(%arg0: i32, %arg1: i32, %arg2: i32) -> (i32, i32, i32) {
    %c0_i32 = arith.constant 0 : i32
    %c0_i32_0 = arith.constant 0 : i32
    return %arg0, %arg1, %c0_i32 : i32, i32, i32
  }
}

</mosaic_0001>

<bundles_post_ra>
// kernel: tpu_custom_call.1
= control target key start
LH: loop header
LB: loop body
LE: loop exit
PB: predicated region body
PF: predicated region fallthrough
CT: control target
= control target key end

     0   :  { %s2373_s0 = inlined_call_operand.hbm [shape: bf16[2,4,8,8], index: 0, kind: input, shape index: {}]   ;;  %s2374_s1 = inlined_call_operand.hbm [shape: bf16[2,4,8,8], index: 1, kind: input, shape index: {}]   ;;  %s2375_s2 = inlined_call_operand.hbm [shape: bf16[2,4,8,8], index: 2, kind: input, shape index: {}]   ;;  %s2376_s3 = inlined_call_operand.vmem [shape: f32[2,1,8], index: 3, kind: input, shape index: {}]   ;;  %s2377_s4 = inlined_call_operand.hbm [shape: bf16[4,8,32], index: 4, kind: input, shape index: {}]   ;;  %s2378_s5 = inlined_call_operand.vmem [shape: f32[1,32], index: 5, kind: input, shape index: {}]   ;;  %s2379_s6 = inlined_call_operand.vmem [shape: f32[1,32], index: 6, kind: input, shape index: {}]   ;;  %s2380_s7 = inlined_call_operand.vmem [shape: f32[1,32], index: 7, kind: input, shape index: {}]   ;;  %s2381_s8 = inlined_call_operand.hbm [shape: f32[2,8,32], index: 8, kind: output, shape index: {}]  }
   0x1   :  { %2395 = sst [smem:[#allocation24_spill]] %s2373_s0 }
   0x2   :  { %2396 = sst [smem:[#allocation25_spill]] %s2374_s1 }
   0x3   :  { %13 = vsyncpa [#allocation6], 0 }
   0x4   :  { %15 = vsyncpa [#allocation6 + $0x1], 0 }
   0x5   :  { %16 = vsyncpa [#allocation9], 0 }
   0x6   :  { %18 = vsyncpa [#allocation9 + $0x1], 0 }
   0x7   :  { %19 = vsyncpa [#allocation12], 0 }
   0x8   :  { %20 = vsyncpa [#allocation7], 0 }
   0x9   :  { %22 = vsyncpa [#allocation7 + $0x1], 0  ;;  %s1972_s27 = smov 0   ;;  %s1974_s28 = smov 0  }
   0xa   :  { %s1976_s29 = smov 0   ;;  %s1978_s30 = smov 0  }
   0xb   :  { %s1980_s9 = smov 0   ;;  %s1982_s10 = smov 0  }
   0xc LB: > { %2397 = sst [smem:[#allocation18_spill]] %s1894_s27  ;;  %s47_s11 = sadd.s32 1, %s1910_s9  ;;  %s1914_s10 = sphi %s1982_s10, %s28_s10   ;;  %s1910_s9 = sphi %s1980_s9, %s2424_s9   ;;  %s1906_s30 = sphi %s1978_s30, %s2423_s30   ;;  %s1902_s29 = sphi %s1976_s29, %s2427_s29   ;;  %s1898_s28 = sphi %s1974_s28, %s2426_s28   ;;  %s1894_s27 = sphi %s1972_s27, %s2425_s27  }
   0xd   : > { %2398 = sst [smem:[#allocation19_spill]] %s1910_s9  ;;  %s56_s12 = sadd.s32 1, %s1902_s29 }
   0xe   : > { %2399 = sst [smem:[#allocation20_spill]] %s1914_s10  ;;  %p49_p0 = scmp.ge.s32.totalorder %s47_s11, 2 }
   0xf   : > { %p63_p1 = scmp.ne.s32.totalorder %s1902_s29, %s1898_s28  ;;  %p64_p2 = scmp.eq.s32.totalorder %s1914_s10, 0 }
  0x10   : > { %s2429_s11 = smov (%p49_p0, %s47_s11), 0  ;;  %p1630_p6 = scmp.lt.s32.totalorder %s1914_s10, 2 }
  0x11   : > { %2400 = sst [smem:[#allocation21_spill]] %s2429_s11  ;;  %p65_p3 = por %p64_p2, %p63_p1 }
  0x12   : > { %s51_s13 = ssub.s32 %s1910_s9, %s2429_s11  ;;  %s2382_s14 = sand.u32 1, %s1902_s29  }
  0x13   : > { %p54_p5 = scmp.eq.s32.totalorder %s51_s13, 0  ;;  %s2018_s15 = sshll.u32 %s1910_s9, 8 }
  0x14   : > { %s2025_s17 = sshll.u32 %s2382_s14, 4  ;;  %p2027_p7 = pnand %p1630_p6, %p65_p3 }
  0x15   : > { %s2021_s16 = scalar_select %p54_p5, %s1902_s29, %s56_s12  }
  0x16   : > { %s333_s19 = sand.u32 1, %s1914_s10   ;;  %s2403_s1 = sld [smem:[#allocation25_spill]] }
  0x17   : > { %2401 = sst [smem:[#allocation22_spill]] %s2021_s16  ;;  %s337_s23 = scalar_lea.vmem [#allocation8], %s2025_s17 }
  0x18   : > { %s345_s24 = sshll.u32 %s337_s23, 4  ;;  %s2037_s25 = scalar_lea.sflag [#allocation9], %s333_s19  ;;  %s346_s24 = int_to_ptr.vmem [resolvable:$true] %s345_s24 }
  0x19   : > { %p2394_p8 = pneg %p2027_p7  ;;  %s1729_s26 = scalar_lea.vmem %s346_s24, 256 }
  0x1a   : > { %p1730_p9 = scmp.ne.s32.totalorder %s346_s24, %s1729_s26  ;;  %s1916_s12 = smov [#allocation8]  }
  0x1b   : > { %s1734_s13 = sshll.u32 %s1916_s12, 4  ;;  %s1735_s13 = int_to_ptr.vmem [resolvable:$false] %s1734_s13 }
  0x1c   : > { %s344_s22 = scalar_lea.hbm %s2403_s1, %s2018_s15  ;;  %p1732_p10 = pnand %p1730_p9, %p2394_p8 }
  0x1d   : > { %s1736_s14 = scalar_lea.vmem %s1735_s13, 512  ;;  %p1737_p12 = scmp.lt.s32.totalorder %s346_s24, %s1735_s13 }
  0x1e   : > { %p1733_p11 = pneg %p1732_p10  ;;  %p1738_p13 = scmp.lt.s32.totalorder %s1736_s14, %s1729_s26 }
  0x20   : > { %p1739_p0 = por %p1738_p13, %p1737_p12 }
  0x22   : > { %p1740_p2 = pnand %p1739_p0, %p1733_p11 }
  0x24   : > { %1743 = shalt.err (!%p1740_p2)
}
  0x25   : > { %s2383_s20 = smov 64   ;;  %s2385_s19 = smov 4  }
  0x26   : > { %1621 = dma.hbm_to_vmem [thread:$0]  (!%p2027_p7), %s344_s22, 256, %s346_s24, %s2037_s25, %s2383_s20, %s2383_s20, %s2385_s19  }
  0x27   : > { %s2051_s14 = sadd.s32 4294967295, %s1914_s10   ;;  %s1461_s21 = sadd.s32 4294967294, %s1914_s10  }
  0x28   : > { %p69_p3 = scmp.ne.s32.totalorder %s1898_s28, %s1894_s27  ;;  %p2393_p5 = scmp.eq.s32.totalorder %s2051_s14, 0 }
  0x29   : > { %p263_p6 = scmp.eq.s32.totalorder %s2051_s14, 1  ;;  %p269_p9 = scmp.eq.s32.totalorder %s1461_s21, 1 }
  0x2a   : > { %p1462_p10 = scmp.ge.s32.totalorder %s1914_s10, 1  ;;  %p2061_p11 = por %p2393_p5, %p69_p3 }
  0x2b   : > { %p2068_p12 = por %p263_p6, %p63_p1  ;;  %p2072_p13 = por %p269_p9, %p69_p3 }
  0x2c   : > { %p276_p0 = scmp.lt.s32.totalorder %s1914_s10, 3  ;;  %s1919_s12 = smov [#allocation11]  }
  0x2d   : > { %s2406_s24 = scalar_select %p2072_p13, 1, 0 }
  0x2e   : > { %p2077_p2 = pnand %p1462_p10, %p276_p0  ;;  %s288_s13 = sshll.u32 %s1919_s12, 4  ;;  %s2081_s13 = int_to_ptr.vmem [resolvable:$true] %s288_s13 }
  0x2f   : > { %2407 = sst [smem:[#allocation23_spill]] %s2406_s24  ;;  %s315_s1 = scalar_lea.vmem [#allocation5], %s2025_s17 }
  0x30   : > { %p1611_p1 = pneg %p2077_p2  ;;  %s2409_s0 = sld [smem:[#allocation24_spill]] }
  0x31   : > { %s323_s11 = sshll.u32 %s315_s1, 4  ;;  %s2411_s16 = sand.u32 1, %s1902_s29   ;;  %s324_s11 = int_to_ptr.vmem [resolvable:$true] %s323_s11 }
  0x32   : > { %p2092_p3 = pnand %p1611_p1, %p2393_p5  ;;  %s312_s10 = scalar_lea.sflag [#allocation6], %s2411_s16 }
  0x33   : > { %s1757_s24 = scalar_lea.vmem %s324_s11, 256  ;;  %s1920_s12 = smov [#allocation5]  }
  0x34   : > { %p1758_p6 = scmp.ne.s32.totalorder %s324_s11, %s1757_s24  ;;  %s1762_s27 = sshll.u32 %s1920_s12, 4  ;;  %s1763_s27 = int_to_ptr.vmem [resolvable:$false] %s1762_s27 }
  0x35   : > { %s1764_s20 = scalar_lea.vmem %s1763_s27, 512  ;;  %p1765_p0 = scmp.lt.s32.totalorder %s324_s11, %s1763_s27 }
  0x36   : > { %s322_s19 = scalar_lea.hbm %s2409_s0, %s2018_s15  ;;  %p1760_p9 = pnand %p1758_p6, %p2394_p8 }
  0x37   : > { %p1766_p4 = scmp.lt.s32.totalorder %s1764_s20, %s1757_s24 }
  0x38   : > { %p1761_p10 = pneg %p1760_p9 }
  0x39   : > { %p1767_p13 = por %p1766_p4, %p1765_p0 }
  0x3b   : > { %p1768_p1 = pnand %p1767_p13, %p1761_p10 }
  0x3d   : > { %1771 = shalt.err (!%p1768_p1)
}
  0x3e   : > { %s2412_s1 = smov 4   ;;  %s2413_s21 = smov 64  }
  0x3f   : > { %1618 = dma.hbm_to_vmem [thread:$0]  (!%p2027_p7), %s322_s19, 256, %s324_s11, %s312_s10, %s2413_s21, %s2413_s21, %s2412_s1  }
  0x40   : > { %p1774_p6 = pneg %p2092_p3  ;;  %s1783_s16 = scalar_lea.vmem %s2081_s13, 256 }
  0x41   : > { %p1784_p9 = scmp.ne.s32.totalorder %s2081_s13, %s1783_s16  ;;  %p1791_p4 = scmp.lt.s32.totalorder %s2081_s13, %s2081_s13 }
  0x42   : > { %p1792_p13 = scmp.lt.s32.totalorder %s1783_s16, %s1783_s16 }
  0x43   : > { %p1786_p5 = pnand %p1784_p9, %p1774_p6 }
  0x44   : > { %p1793_p10 = por %p1792_p13, %p1791_p4 }
  0x45   : > { %p1787_p8 = pneg %p1786_p5 }
  0x47   : > { %p1794_p0 = pnand %p1793_p10, %p1787_p8 }
  0x49   : > { %1797 = shalt.err (!%p1794_p0)
}
  0x4a   : > { %1614 = dma.hbm_to_vmem [thread:$0]  (!%p2092_p3), %s2377_s4, 256, %s2081_s13, [#allocation12], %s2413_s21, %s2413_s21, %s2412_s1  }
  0x4b   : > { %s366_s24 = scalar_lea.hbm %s2375_s2, %s2018_s15  ;;  %s359_s12 = scalar_lea.vmem [#allocation10], %s2025_s17 }
  0x4c   : > { %s367_s20 = sshll.u32 %s359_s12, 4  ;;  %p2414_p5 = pneg %p2027_p7  ;;  %s368_s20 = int_to_ptr.vmem [resolvable:$true] %s367_s20 }
  0x4d   : > { %s1811_s16 = scalar_lea.vmem %s368_s20, 256  ;;  %s1921_s9 = smov [#allocation10]  }
  0x4e   : > { %p1812_p8 = scmp.ne.s32.totalorder %s368_s20, %s1811_s16  ;;  %s1816_s0 = sshll.u32 %s1921_s9, 4  ;;  %s1817_s0 = int_to_ptr.vmem [resolvable:$false] %s1816_s0 }
  0x4f   : > { %s1818_s27 = scalar_lea.vmem %s1817_s0, 512  ;;  %p1819_p9 = scmp.lt.s32.totalorder %s368_s20, %s1817_s0 }
  0x50   : > { %p1814_p1 = pnand %p1812_p8, %p2414_p5  ;;  %p1820_p4 = scmp.lt.s32.totalorder %s1818_s27, %s1811_s16 }
  0x52   : > { %p1815_p6 = pneg %p1814_p1  ;;  %p1821_p3 = por %p1820_p4, %p1819_p9 }
  0x54   : > { %p1822_p13 = pnand %p1821_p3, %p1815_p6 }
  0x56   : > { %1825 = shalt.err (!%p1822_p13)
}
  0x57   : > { %1624 = dma.hbm_to_vmem [thread:$0]  (!%p2027_p7), %s366_s24, 256, %s368_s20, %s2037_s25, %s2413_s21, %s2413_s21, %s2412_s1  }
  0x58   : > { %388 = sbr.rel (%p2077_p2) target bundleno = 1407 (0x57f), region = 52  ;;  %s2138_s15 = sand.u32 (!%p2077_p2), 1, %s1898_s28  }
  0x59   : > { %s1475_s0 = sshll.u32 (!%p2077_p2), %s2138_s15, 4  ;;  %s391_s17 = scalar_lea.sflag (!%p2077_p2), [#allocation6], %s2138_s15 }
  0x5a   : > { %s2142_s13 = scalar_lea.vmem (!%p2077_p2), [#allocation5], %s1475_s0 }
  0x5d   : > { %1877 = dma.done.wait (%p2061_p11), %s391_s17, 256  }
  0x5e   : > { %1879 = vsyncadd (%p2061_p11), %s391_s17, 4294967040  ;;  %s399_s18 = sand.u32 1, %s2051_s14   ;;  %s403_s26 = scalar_lea.vmem [#allocation8], %s1475_s0 }
  0x5f   : > { %s400_s25 = scalar_lea.sflag [#allocation9], %s399_s18 }
  0x60   : > { %1881 = dma.done.wait (%p2061_p11), %s400_s25, 512  }
  0x61   : > { %1883 = vsyncadd (%p2061_p11), %s400_s25, 4294966784  ;;  %s2153_s1 = scalar_lea.vmem [#allocation10], %s1475_s0  ;;  %p2415_p7 = scmp.eq.s32.totalorder %s2051_s14, 0 }
  0x63   : > { %1885 = dma.done.wait (%p2415_p7), [#allocation12], 256   ;;  %p2416_p2 = pmov %p2415_p7 }
  0x64   : > { %vm485_vm0 = vcmask 64512   ;;  %v1922_v0 = vmov 0.0   ;;  %vm1923_vm1 = vmmov 0   ;;  %vm513_vm2 = vcmask 1043456   ;;  %v494_v1 = vld [vmem:[%s403_s26] sm:$0xf] }
  0x65   : > { %1887 = vsyncadd (%p2416_p2), [#allocation12], 4294967040  ;;  %1527 = vmatprep.subr.bf16.mxu0 %v1922_v0  ;;  %1533 = vmatprep.subr.bf16.mxu1 %v1922_v0  ;;  %486 = vst.msk [vmem:[#allocation4] sm:$0xff] %vm485_vm0, %v1922_v0  ;;  %v495_v2 = vld [vmem:[%s403_s26 + $0x4] sm:$0xf]  ;;  %v515_v3 = vsel %vm513_vm2, %v494_v1, 0 }
  0x66   : > { %487 = vst.msk [vmem:[#allocation4 + $0x8] sm:$0xff] %vm485_vm0, %v1922_v0  ;;  %488 = vst.msk [vmem:[#allocation4 + $0x10] sm:$0xff] %vm485_vm0, %v1922_v0  ;;  %1529 = vmatprep.mubr.msk.bf16.mxu0 %vm1923_vm1, %v1922_v0  ;;  %1535 = vmatprep.mubr.msk.bf16.mxu1 %vm1923_vm1, %v1922_v0  ;;  %v561_v4 = vsel %vm513_vm2, %v495_v2, 0  ;;  %v496_v5 = vld [vmem:[%s403_s26 + $0x8] sm:$0xf]  ;;  %vm476_vm3 = vcmask 7168  }
  0x67   : > { %489 = vst.msk [vmem:[#allocation4 + $0x18] sm:$0xff] %vm485_vm0, %v1922_v0  ;;  %1528 = vmatpush3.bf16.msra.mxu0 %v515_v3  ;;  %1534 = vmatpush3.bf16.msra.mxu1 %v561_v4  ;;  %v490_v6 = vld [vmem:[%s2142_s13] sm:$0xf]  ;;  %v491_v7 = vld [vmem:[%s2142_s13 + $0x4] sm:$0xf]  ;;  %v607_v9 = vsel %vm513_vm2, %v496_v5, 0 }
  0x68   : > { %v497_v8 = vld [vmem:[%s403_s26 + $0xc] sm:$0xf]  ;;  %1539 = vmatprep.subr.bf16.mxu0 %v1922_v0  ;;  %1545 = vmatprep.subr.bf16.mxu1 %v1922_v0  ;;  %v492_v11 = vld [vmem:[%s2142_s13 + $0x8] sm:$0xf]  ;;  %v1924_v13 = vmov -inf   ;;  %481 = vst.msk [vmem:[#allocation3] sm:$0xff] %vm476_vm3, %v1922_v0 }
  0x69   : > { %v653_v10 = vsel %vm513_vm2, %v497_v8, 0  ;;  %v493_v12 = vld [vmem:[%s2142_s13 + $0xc] sm:$0xf]  ;;  %477 = vst.msk [vmem:[#allocation2] sm:$0xff] %vm476_vm3, %v1924_v13  ;;  %478 = vst.msk [vmem:[#allocation2 + $0x8] sm:$0xff] %vm476_vm3, %v1924_v13  ;;  %p465_p11 = scmp.lt.s32.totalorder %s1906_s30, 1 }
  0x6a   : > { %1530 = vmatmul.mubr.msk.bf16.vlgmr.msra.gmra.mxu0 %vm485_vm0, %v490_v6  ;;  %1536 = vmatmul.mubr.msk.bf16.vlgmr.msra.gmra.mxu1 %vm485_vm0, %v491_v7  ;;  %479 = vst.msk [vmem:[#allocation2 + $0x10] sm:$0xff] %vm476_vm3, %v1924_v13  ;;  %480 = vst.msk [vmem:[#allocation2 + $0x18] sm:$0xff] %vm476_vm3, %v1924_v13  ;;  %v1925_v39 = vmov 0   ;;  %v498_v55 = vld [vmem:[%s2153_s1] sm:$0xf]  ;;  %vm1260_vm4 = vcmask 261120  }
  0x6b   : > { %1540 = vmatpush3.bf16.msra.mxu0 %v607_v9  ;;  %1546 = vmatpush3.bf16.msra.mxu1 %v653_v10  ;;  %482 = vst.msk [vmem:[#allocation3 + $0x8] sm:$0xff] %vm476_vm3, %v1922_v0  ;;  %483 = vst.msk [vmem:[#allocation3 + $0x10] sm:$0xff] %vm476_vm3, %v1922_v0  ;;  %s466_s14 = scalar_select %p465_p11, %s1906_s30, 1  ;;  %v824_v57 = vsel %vm513_vm2, %v498_v55, 0  ;;  %v499_v58 = vld [vmem:[%s2153_s1 + $0x4] sm:$0xf] }
  0x6c   : > { %1541 = vmatprep.mubr.msk.bf16.mxu0 %vm1923_vm1, %v1922_v0  ;;  %1547 = vmatprep.mubr.msk.bf16.mxu1 %vm1923_vm1, %v1922_v0  ;;  %484 = vst.msk [vmem:[#allocation3 + $0x18] sm:$0xff] %vm476_vm3, %v1922_v0  ;;  %v870_v59 = vsel %vm513_vm2, %v499_v58, 0  ;;  %v500_v9 = vld [vmem:[%s2153_s1 + $0x8] sm:$0xf]  ;;  %v1061_v55 = vld [vmem:[#allocation11 + $0x4] sm:$0xf] }
  0x6d   : > { %1551 = vmatprep.subr.bf16.mxu0 %v1922_v0  ;;  %1557 = vmatprep.subr.bf16.mxu1 %v1922_v0  ;;  %s470_s10 = scalar_lea.vmem %s2376_s3, %s466_s14  ;;  %v916_v13 = vsel %vm513_vm2, %v500_v9, 0  ;;  %s1479_s24 = sshll.u32 %s2138_s15, 3 }
  0x6e   : > { %v1480_v14 = vld [vmem:[%s470_s10] ss:$0 sm:$0xff]  ;;  %1688 = vset.pattern.permute.xlu0 %v1925_v39  ;;  %1689 = vset.pattern.permute.xlu1 %v1925_v39  ;;  %s1497_s27 = sshll.u32 %s1906_s30, 7  ;;  %s464_s0 = scalar_lea.vmem [#allocation13], %s1479_s24 }
  0x6f   : > { %s1307_s17 = sshll.u32 %s464_s0, 4  ;;  %s1305_s25 = scalar_lea.hbm %s2381_s8, %s1497_s27  ;;  %s1308_s17 = int_to_ptr.vmem [resolvable:$true] %s1307_s17 }
  0x70   : > { %v2224_v40 = vld [vmem:[#allocation2] sm:$0xff]  ;;  %v2227_v43 = vld [vmem:[#allocation2 + $0x8] sm:$0xff]  ;;  %s1293_s26 = scalar_lea.sflag [#allocation7], %s2138_s15  ;;  %s1926_s14 = smov [#allocation13]  }
  0x71   : > { %v2234_v47 = vld [vmem:[#allocation2 + $0x10] sm:$0xff]  ;;  %v2244_v51 = vld [vmem:[#allocation2 + $0x18] sm:$0xff]  ;;  %s1830_s23 = sshll.u32 %s1926_s14, 4  ;;  %s1831_s23 = int_to_ptr.vmem [resolvable:$false] %s1830_s23 }
  0x72   : > { %1542 = vmatmul.mubr.msk.bf16.vlgmr.msra.gmra.mxu0 %vm485_vm0, %v492_v11  ;;  %1548 = vmatmul.mubr.msk.bf16.vlgmr.msra.gmra.mxu1 %vm485_vm0, %v493_v12  ;;  %s1832_s30 = scalar_lea.vmem %s1831_s23, 256  ;;  %p1833_p5 = scmp.lt.s32.totalorder %s1308_s17, %s1831_s23 }
  0x73   : > { %1553 = vmatprep.mubr.msk.bf16.mxu0 %vm1923_vm1, %v1922_v0  ;;  %1559 = vmatprep.mubr.msk.bf16.mxu1 %vm1923_vm1, %v1922_v0 }
  0x74   : > { %1552 = vmatpush3.bf16.msra.mxu0 %v824_v57  ;;  %1558 = vmatpush3.bf16.msra.mxu1 %v870_v59  ;;  %v1066_v57 = vsel %vm513_vm2, %v1061_v55, 0 }
  0x75   : > { %1563 = vmatprep.subr.bf16.mxu0 %v1922_v0  ;;  %1569 = vmatprep.subr.bf16.mxu1 %v1922_v0 }
 0x12a   : > { %v551_v15 = vpop.f32.mrf.mxu0  ;;  %v597_v16 = vpop.f32.mrf.mxu1 }
 0x12b   : > { %v2214_v17 = vadd.f32 %v1480_v14, %v551_v15  ;;  %v2216_v18 = vadd.f32 %v1480_v14, %v597_v16 }
 0x12c   : > { %v1531_v19 = vpop.f32.mrf.mxu0  ;;  %v1537_v20 = vpop.f32.mrf.mxu1 }
 0x12d   : > { %v699_v21 = vsel %vm485_vm0, %v2214_v17, -inf  ;;  %v702_v24 = vsel %vm485_vm0, %v2216_v18, -inf }
 0x12e   : > { %v600_v22 = vpop.f32.mrf.mxu1  ;;  %700 = vmax.xlane.f32.xlu0 %v699_v21  ;;  %v554_v23 = vpop.f32.mrf.mxu0 }
 0x130   : > { %v1532_v25 = vpop.f32.mrf.mxu0  ;;  %v1538_v26 = vpop.f32.mrf.mxu1 }
 0x132   : > { %v689_v27 = vpop.f32.mrf.mxu1  ;;  %703 = vmax.xlane.f32.xlu0 %v702_v24  ;;  %v643_v28 = vpop.f32.mrf.mxu0 }
 0x133   : > { %v690_v29 = vadd.f32 %v1480_v14, %v689_v27  ;;  %v644_v30 = vadd.f32 %v1480_v14, %v643_v28  ;;  %v501_v14 = vld [vmem:[%s2153_s1 + $0xc] sm:$0xf]  ;;  %s1826_s1 = scalar_lea.vmem %s1308_s17, 128 }
 0x134   : > { %v1543_v31 = vpop.f32.mrf.mxu0  ;;  %v1549_v32 = vpop.f32.mrf.mxu1  ;;  %p1827_p10 = scmp.ne.s32.totalorder %s1308_s17, %s1826_s1  ;;  %p1834_p1 = scmp.lt.s32.totalorder %s1832_s30, %s1826_s1 }
 0x135   : > { %v705_v33 = vsel %vm485_vm0, %v644_v30, -inf  ;;  %v708_v36 = vsel %vm485_vm0, %v690_v29, -inf }
 0x136   : > { %v692_v34 = vpop.f32.mrf.mxu1  ;;  %706 = vmax.xlane.f32.xlu1 %v705_v33  ;;  %v646_v35 = vpop.f32.mrf.mxu0  ;;  %v763_v33 = vld [vmem:[#allocation3] sm:$0xff]  ;;  %p1828_p0 = pnand %p1827_p10, %p2068_p12  ;;  %p1835_p6 = por %p1834_p1, %p1833_p5 }
 0x138   : > { %v1544_v37 = vpop.f32.mrf.mxu0  ;;  %v1550_v38 = vpop.f32.mrf.mxu1  ;;  %p1829_p8 = pneg %p1828_p0 }
 0x13a   : > { %709 = vmax.xlane.f32.xlu1 %v708_v36  ;;  %v764_v36 = vld [vmem:[#allocation3 + $0x8] sm:$0xff]  ;;  %p1836_p9 = pnand %p1835_p6, %p1829_p8 }
 0x1b7   : > { %v701_v41 = vpop.xlane.xlu0 %700 }
 0x1b8   : > { %v711_v42 = vmax.f32 %v2224_v40, %v701_v41 }
 0x1ba   : > { %v715_v44 = vsub.f32 %v2224_v40, %v711_v42  ;;  %1012 = vst.msk [vmem:[#allocation2] sm:$0xff] %vm476_vm3, %v711_v42  ;;  %729 = vperm.xlu0 %1688, %v711_v42   ;;  %v765_v40 = vld [vmem:[#allocation3 + $0x10] sm:$0xff] }
 0x1bb   : > { %v704_v45 = vpop.xlane.xlu0 %703 }
 0x1bc   : > { %v2232_v46 = vmax.f32 %v2227_v43, %v704_v45  ;;  %v719_v19 = vmul.f32 1.442695, %v715_v44  ;;  %v766_v44 = vld [vmem:[#allocation3 + $0x18] sm:$0xff] }
 0x1be   : > { %v716_v48 = vsub.f32 %v2227_v43, %v2232_v46  ;;  %1013 = vst.msk [vmem:[#allocation2 + $0x8] sm:$0xff] %vm476_vm3, %v2232_v46  ;;  %734 = vperm.xlu1 %1689, %v2232_v46  }
 0x1bf   : > { %v707_v49 = vpop.xlane.xlu1 %706 }
 0x1c0   : > { %v2242_v50 = vmax.f32 %v2234_v47, %v707_v49  ;;  %v721_v24 = vmul.f32 1.442695, %v716_v48 }
 0x1c2   : > { %v717_v52 = vsub.f32 %v2234_v47, %v2242_v50  ;;  %1014 = vst.msk [vmem:[#allocation2 + $0x10] sm:$0xff] %vm476_vm3, %v2242_v50  ;;  %739 = vperm.xlu1 %1689, %v2242_v50  }
 0x1c3   : > { %v710_v53 = vpop.xlane.xlu1 %709 }
 0x1c4   : > { %v2252_v54 = vmax.f32 %v2244_v51, %v710_v53  ;;  %v723_v27 = vmul.f32 1.442695, %v717_v52  ;;  %v1059_v52 = vld [vmem:[#allocation11] sm:$0xf] }
 0x1c5   : > { %v1112_v53 = vsel %vm513_vm2, %v1059_v52, 0 }
 0x1c6   : > { %v718_v56 = vsub.f32 %v2244_v51, %v2252_v54  ;;  %1015 = vst.msk [vmem:[#allocation2 + $0x18] sm:$0xff] %vm476_vm3, %v2252_v54  ;;  %744 = vperm.xlu1 %1689, %v2252_v54  }
 0x1c8   : > { %v725_v28 = vmul.f32 1.442695, %v718_v56 }
 0x235   : > { %v730_v60 = vpop.permute.xlu0 %729 }
 0x236   : > { %v747_v61 = vsub.f32 %v2214_v17, %v730_v60 }
 0x238   : > { %v751_v62 = vmul.f32 1.442695, %v747_v61 }
 0x239   : > { %v735_v63 = vpop.permute.xlu1 %734 }
 0x23a   : > { %1690 = vpow2.f32 %v751_v62  ;;  %v748_v1 = vsub.f32 %v2216_v18, %v735_v63  ;;  %v962_v18 = vsel %vm513_vm2, %v501_v14, 0  ;;  %v792_v62 = vld [vmem:[#allocation4] sm:$0xff] }
 0x23c   : > { %v753_v2 = vmul.f32 1.442695, %v748_v1 }
 0x23d   : > { %v740_v3 = vpop.permute.xlu1 %739 }
 0x23e   : > { %1692 = vpow2.f32 %v753_v2  ;;  %v749_v4 = vsub.f32 %v644_v30, %v740_v3  ;;  %v793_v2 = vld [vmem:[#allocation4 + $0x8] sm:$0xff] }
 0x240   : > { %v755_v5 = vmul.f32 1.442695, %v749_v4 }
 0x241   : > { %v745_v6 = vpop.permute.xlu1 %744 }
 0x242   : > { %1694 = vpow2.f32 %v755_v5  ;;  %v750_v7 = vsub.f32 %v690_v29, %v745_v6 }
 0x244   : > { %v757_v8 = vmul.f32 1.442695, %v750_v7 }
 0x246   : > { %1696 = vpow2.f32 %v757_v8  ;;  %v794_v8 = vld [vmem:[#allocation4 + $0x10] sm:$0xff] }
 0x247   : > { %v1691_v10 = vpop.eup %1690  ;;  %1698 = vpow2.f32 %v719_v19 }
 0x248   : > { %v771_v11 = vsel %vm485_vm0, %v1691_v10, 0.0  ;;  %v759_v12 = vpack.c.bf16 %v1691_v10, %v1691_v10  ;;  %1700 = vpow2.f32 %v721_v24 }
 0x249   : > { %772 = vadd.xlane.f32.xlu0 %v771_v11  ;;  %1702 = vpow2.f32 %v723_v27 }
 0x24a   : > { %1554 = vmatmul.mubr.msk.bf16.vlgmr.msra.gmra.mxu0 %vm485_vm0, %v759_v12  ;;  %1704 = vpow2.f32 %v725_v28 }
 0x24b   : > { %v1693_v15 = vpop.eup %1692  ;;  %1564 = vmatpush3.bf16.msra.mxu0 %v916_v13  ;;  %1565 = vmatprep.mubr.msk.bf16.mxu0 %vm1923_vm1, %v1922_v0 }
 0x24c   : > { %v774_v16 = vsel %vm485_vm0, %v1693_v15, 0.0  ;;  %v760_v17 = vpack.c.bf16 %v1693_v15, %v1693_v15  ;;  %1575 = vmatprep.subr.bf16.mxu0 %v1922_v0 }
 0x24d   : > { %775 = vadd.xlane.f32.xlu1 %v774_v16  ;;  %v795_v16 = vld [vmem:[#allocation4 + $0x18] sm:$0xff] }
 0x24e   : > { %1560 = vmatmul.mubr.msk.bf16.vlgmr.msra.gmra.mxu1 %vm485_vm0, %v760_v17 }
 0x24f   : > { %v1695_v20 = vpop.eup %1694  ;;  %1570 = vmatpush3.bf16.msra.mxu1 %v962_v18  ;;  %1571 = vmatprep.mubr.msk.bf16.mxu1 %vm1923_vm1, %v1922_v0 }
 0x250   : > { %v777_v21 = vsel %vm485_vm0, %v1695_v20, 0.0  ;;  %v761_v22 = vpack.c.bf16 %v1695_v20, %v1695_v20  ;;  %1581 = vmatprep.subr.bf16.mxu1 %v1922_v0 }
 0x251   : > { %778 = vadd.xlane.f32.xlu1 %v777_v21 }
 0x252   : > { %1566 = vmatmul.mubr.msk.bf16.vlgmr.msra.gmra.mxu0 %vm485_vm0, %v761_v22 }
 0x253   : > { %v1697_v23 = vpop.eup %1696  ;;  %1577 = vmatprep.mubr.msk.bf16.mxu0 %vm1923_vm1, %v1922_v0  ;;  %1576 = vmatpush3.bf16.msra.mxu0 %v1066_v57 }
 0x254   : > { %v780_v25 = vsel %vm485_vm0, %v1697_v23, 0.0  ;;  %v762_v26 = vpack.c.bf16 %v1697_v23, %v1697_v23  ;;  %v1699_v29 = vpop.eup %1698  ;;  %1587 = vmatprep.subr.bf16.mxu0 %v1922_v0 }
 0x255   : > { %781 = vadd.xlane.f32.xlu1 %v780_v25  ;;  %v1701_v30 = vpop.eup %1700  ;;  %v767_v34 = vmul.f32 %v1699_v29, %v763_v33 }
 0x256   : > { %1572 = vmatmul.mubr.msk.bf16.vlgmr.msra.gmra.mxu1 %vm485_vm0, %v762_v26  ;;  %v1703_v31 = vpop.eup %1702  ;;  %v768_v38 = vmul.f32 %v1701_v30, %v764_v36 }
 0x257   : > { %1583 = vmatprep.mubr.msk.bf16.mxu1 %vm1923_vm1, %v1922_v0  ;;  %v1705_v32 = vpop.eup %1704  ;;  %v769_v42 = vmul.f32 %v1703_v31, %v765_v40  ;;  %1582 = vmatpush3.bf16.msra.mxu1 %v1112_v53 }
 0x258   : > { %v770_v47 = vmul.f32 %v1705_v32, %v766_v44  ;;  %1593 = vmatprep.subr.bf16.mxu1 %v1922_v0 }
 0x25f   : > { %798 = vperm.xlu0 %1688, %v1699_v29  }
 0x266   : > { %803 = vperm.xlu1 %1689, %v1701_v30  }
 0x26a   : > { %808 = vperm.xlu1 %1689, %v1703_v31  }
 0x26e   : > { %813 = vperm.xlu1 %1689, %v1705_v32   ;;  %v1204_v32 = vld [vmem:[#allocation11 + $0xc] sm:$0xf] }
 0x2d2   : > { %v773_v35 = vpop.xlane.xlu0 %772 }
 0x2d3   : > { %v783_v37 = vadd.f32 %v773_v35, %v767_v34  ;;  %v1209_v35 = vsel %vm513_vm2, %v1204_v32, 0 }
 0x2d5   : > { %788 = vst.msk [vmem:[#allocation3] sm:$0xff] %vm476_vm3, %v783_v37 }
 0x2d6   : > { %v776_v39 = vpop.xlane.xlu1 %775 }
 0x2d7   : > { %v784_v41 = vadd.f32 %v776_v39, %v768_v38  ;;  %v1155_v38 = vld [vmem:[#allocation11 + $0x8] sm:$0xf] }
 0x2d9   : > { %789 = vst.msk [vmem:[#allocation3 + $0x8] sm:$0xff] %vm476_vm3, %v784_v41  ;;  %v1160_v41 = vsel %vm513_vm2, %v1155_v38, 0 }
 0x2da   : > { %v779_v43 = vpop.xlane.xlu1 %778  ;;  %v799_v63 = vpop.permute.xlu0 %798 }
 0x2db   : > { %v785_v45 = vadd.f32 %v779_v43, %v769_v42  ;;  %v816_v1 = vmul.f32 %v799_v63, %v792_v62  ;;  %v1493_v63 = vld [vmem:[%s2378_s5] ss:$0 sm:$0xff] }
 0x2dc   : > { %v1019_v46 = vld [vmem:[#allocation3] sm:$0xff] }
 0x2dd   : > { %790 = vst.msk [vmem:[#allocation3 + $0x10] sm:$0xff] %vm476_vm3, %v785_v45  ;;  %1706 = vrcp.f32 %v1019_v46 }
 0x2de   : > { %v782_v48 = vpop.xlane.xlu1 %781 }
 0x2df   : > { %v786_v49 = vadd.f32 %v782_v48, %v770_v47 }
 0x2e0   : > { %v1020_v50 = vld [vmem:[#allocation3 + $0x8] sm:$0xff] }
 0x2e1   : > { %791 = vst.msk [vmem:[#allocation3 + $0x18] sm:$0xff] %vm476_vm3, %v786_v49  ;;  %1708 = vrcp.f32 %v1020_v50 }
 0x2e2   : > { %v804_v61 = vpop.permute.xlu1 %803 }
 0x2e3   : > { %v817_v7 = vmul.f32 %v804_v61, %v793_v2 }
 0x2e4   : > { %v1021_v51 = vld [vmem:[#allocation3 + $0x10] sm:$0xff] }
 0x2e5   : > { %1710 = vrcp.f32 %v1021_v51 }
 0x2e6   : > { %v809_v4 = vpop.permute.xlu1 %808 }
 0x2e7   : > { %v818_v14 = vmul.f32 %v809_v4, %v794_v8 }
 0x2e8   : > { %v1022_v54 = vld [vmem:[#allocation3 + $0x18] sm:$0xff] }
 0x2e9   : > { %1712 = vrcp.f32 %v1022_v54 }
 0x2ea   : > { %v1707_v56 = vpop.eup %1706  ;;  %v814_v15 = vpop.permute.xlu1 %813 }
 0x2eb   : > { %1033 = vperm.xlu0 %1688, %v1707_v56   ;;  %v819_v22 = vmul.f32 %v814_v15, %v795_v16 }
 0x2ee   : > { %v1709_v58 = vpop.eup %1708 }
 0x2ef   : > { %1038 = vperm.xlu1 %1689, %v1709_v58  }
 0x2f2   : > { %v1711_v59 = vpop.eup %1710 }
 0x2f3   : > { %1043 = vperm.xlu1 %1689, %v1711_v59  }
 0x2f6   : > { %v1713_v60 = vpop.eup %1712 }
 0x2f7   : > { %1048 = vperm.xlu0 %1688, %v1713_v60  }
 0x30a   : > { %v860_v3 = vpop.f32.mrf.mxu0 }
 0x30b   : > { %v1004_v5 = vadd.f32 %v860_v3, %v816_v1 }
 0x30c   : > { %v1555_v6 = vpop.f32.mrf.mxu0 }
 0x30d   : > { %1008 = vst.msk [vmem:[#allocation4] sm:$0xff] %vm485_vm0, %v1004_v5 }
 0x30e   : > { %v863_v9 = vpop.f32.mrf.mxu0  ;;  %v906_v10 = vpop.f32.mrf.mxu1 }
 0x30f   : > { %v1005_v11 = vadd.f32 %v906_v10, %v817_v7 }
 0x310   : > { %v1556_v12 = vpop.f32.mrf.mxu0  ;;  %v1561_v13 = vpop.f32.mrf.mxu1 }
 0x311   : > { %1009 = vst.msk [vmem:[#allocation4 + $0x8] sm:$0xff] %vm485_vm0, %v1005_v11 }
 0x312   : > { %v909_v17 = vpop.f32.mrf.mxu1  ;;  %v952_v18 = vpop.f32.mrf.mxu0 }
 0x313   : > { %v1006_v19 = vadd.f32 %v952_v18, %v818_v14  ;;  %v1494_v17 = vld [vmem:[%s2379_s6] ss:$0 sm:$0xff] }
 0x314   : > { %v1562_v20 = vpop.f32.mrf.mxu1  ;;  %v1567_v21 = vpop.f32.mrf.mxu0  ;;  %v1027_v30 = vld [vmem:[#allocation4] sm:$0xff] }
 0x315   : > { %1010 = vst.msk [vmem:[#allocation4 + $0x10] sm:$0xff] %vm485_vm0, %v1006_v19  ;;  %v1495_v19 = vld [vmem:[%s2380_s7] ss:$0 sm:$0xff] }
 0x316   : > { %v955_v23 = vpop.f32.mrf.mxu0  ;;  %v998_v24 = vpop.f32.mrf.mxu1 }
 0x317   : > { %v1007_v25 = vadd.f32 %v998_v24, %v819_v22 }
 0x318   : > { %v1568_v26 = vpop.f32.mrf.mxu0  ;;  %v1573_v27 = vpop.f32.mrf.mxu1  ;;  %v1028_v36 = vld [vmem:[#allocation4 + $0x8] sm:$0xff] }
 0x319   : > { %1011 = vst.msk [vmem:[#allocation4 + $0x18] sm:$0xff] %vm485_vm0, %v1007_v25 }
 0x31a   : > { %v1001_v28 = vpop.f32.mrf.mxu1 }
 0x31c   : > { %v1574_v29 = vpop.f32.mrf.mxu1  ;;  %v1029_v43 = vld [vmem:[#allocation4 + $0x10] sm:$0xff] }
 0x320   : > { %v1030_v45 = vld [vmem:[#allocation4 + $0x18] sm:$0xff] }
 0x366   : > { %v1034_v31 = vpop.permute.xlu0 %1033 }
 0x367   : > { %v1051_v33 = vmul.f32 %v1034_v31, %v1027_v30 }
 0x369   : > { %v1055_v34 = vpack.c.bf16 %v1051_v33, %v1051_v33 }
 0x36a   : > { %v1039_v37 = vpop.permute.xlu1 %1038 }
 0x36b   : > { %v1052_v39 = vmul.f32 %v1039_v37, %v1028_v36  ;;  %1584 = vmatmul.mubr.msk.bf16.vlgmr.msra.gmra.mxu1 %vm485_vm0, %v1055_v34 }
 0x36c   : > { %1594 = vmatpush3.bf16.msra.mxu1 %v1209_v35  ;;  %1595 = vmatprep.mubr.msk.bf16.mxu1 %vm1923_vm1, %v1922_v0 }
 0x36d   : > { %v1056_v40 = vpack.c.bf16 %v1052_v39, %v1052_v39 }
 0x36e   : > { %v1044_v42 = vpop.permute.xlu1 %1043 }
 0x36f   : > { %1578 = vmatmul.mubr.msk.bf16.vlgmr.msra.gmra.mxu0 %vm485_vm0, %v1056_v40  ;;  %v1053_v44 = vmul.f32 %v1044_v42, %v1029_v43 }
 0x370   : > { %1588 = vmatpush3.bf16.msra.mxu0 %v1160_v41  ;;  %1589 = vmatprep.mubr.msk.bf16.mxu0 %vm1923_vm1, %v1922_v0 }
 0x371   : > { %v1057_v48 = vpack.c.bf16 %v1053_v44, %v1053_v44 }
 0x372   : > { %v1049_v46 = vpop.permute.xlu0 %1048 }
 0x373   : > { %v1054_v47 = vmul.f32 %v1049_v46, %v1030_v45 }
 0x375   : > { %v1058_v49 = vpack.c.bf16 %v1054_v47, %v1054_v47 }
 0x377   : > { %1590 = vmatmul.mubr.msk.bf16.vlgmr.msra.gmra.mxu0 %vm485_vm0, %v1057_v48  ;;  %1596 = vmatmul.mubr.msk.bf16.vlgmr.msra.gmra.mxu1 %vm485_vm0, %v1058_v49 }
 0x42b   : > { %v1148_v50 = vpop.f32.mrf.mxu1 }
 0x42d   : > { %v1585_v51 = vpop.f32.mrf.mxu1 }
 0x42f   : > { %v1102_v52 = vpop.f32.mrf.mxu0  ;;  %v1151_v53 = vpop.f32.mrf.mxu1 }
 0x430   : > { %v1149_v58 = vadd.f32 %v1148_v50, %v1102_v52 }
 0x431   : > { %v1579_v54 = vpop.f32.mrf.mxu0  ;;  %v1586_v55 = vpop.f32.mrf.mxu1 }
 0x433   : > { %v1105_v56 = vpop.f32.mrf.mxu0 }
 0x435   : > { %v1580_v57 = vpop.f32.mrf.mxu0 }
 0x437   : > { %v1196_v0 = vpop.f32.mrf.mxu0  ;;  %v1245_v59 = vpop.f32.mrf.mxu1 }
 0x438   : > { %v1202_v60 = vadd.f32 %v1196_v0, %v1149_v58 }
 0x439   : > { %v1591_v61 = vpop.f32.mrf.mxu0  ;;  %v1597_v62 = vpop.f32.mrf.mxu1 }
 0x43a   : > { %v1251_v1 = vadd.f32 %v1245_v59, %v1202_v60 }
 0x43b   : > { %v1199_v2 = vpop.f32.mrf.mxu0  ;;  %v1248_v3 = vpop.f32.mrf.mxu1 }
 0x43c   : > { %v1259_v4 = vadd.f32 %v1493_v63, %v1251_v1 }
 0x43d   : > { %v1592_v5 = vpop.f32.mrf.mxu0  ;;  %v1598_v6 = vpop.f32.mrf.mxu1 }
 0x43e   : > { %v1261_v7 = vsel %vm1260_vm4, %v1259_v4, 0.0 }
 0x43f   : > { %1262 = vadd.xlane.f32.xlu1 %v1261_v7 }
 0x4c8   : > { %v1263_v8 = vpop.xlane.xlu1 %1262 }
 0x4c9   : > { %v1265_v9 = vmul.f32 0.03125, %v1263_v8 }
 0x4cb   : > { %v1266_v10 = vsub.f32 %v1259_v4, %v1265_v9 }
 0x4cd   : > { %v1267_v11 = vmul.f32 %v1266_v10, %v1266_v10 }
 0x4cf   : > { %v1268_v12 = vsel %vm1260_vm4, %v1267_v11, 0.0 }
 0x4d0   : > { %1269 = vadd.xlane.f32.xlu0 %v1268_v12 }
 0x559   : > { %v1270_v13 = vpop.xlane.xlu0 %1269 }
 0x55a   : > { %v1271_v14 = vmul.f32 0.03125, %v1270_v13 }
 0x55c   : > { %v1272_v15 = vadd.f32 1e-05, %v1271_v14 }
 0x55e   : > { %1714 = vrsqrt.f32 %v1272_v15 }
 0x56b   : > { %v1715_v16 = vpop.eup %1714 }
 0x56c   : > { %v1274_v18 = vmul.f32 %v1715_v16, %v1266_v10 }
 0x56e   : > { %v1282_v20 = vmul.f32 %v1494_v17, %v1274_v18 }
 0x570   : > { %v1290_v21 = vadd.f32 %v1495_v19, %v1282_v20 }
 0x572   : > { %1291 = vst.msk [vmem:[%s464_s0] sm:$0xff] %vm1260_vm4, %v1290_v21 }
 0x573   : > { %1839 = shalt.err (!%p1836_p9)
}
 0x574   : > { %s1840_s21 = scalar_lea.hbm %s1305_s25, 128  ;;  %s1844_s11 = scalar_lea.hbm %s2381_s8, 256 }
 0x575   : > { %p1841_p4 = scmp.ne.s32.totalorder %s1305_s25, %s1840_s21  ;;  %p1845_p7 = scmp.lt.s32.totalorder %s1305_s25, %s2381_s8 }
 0x576   : > { %p1846_p2 = scmp.lt.s32.totalorder %s1844_s11, %s1840_s21 }
 0x577   : > { %p1842_p3 = pnand %p1841_p4, %p2068_p12 }
 0x578   : > { %p1847_p11 = por %p1846_p2, %p1845_p7 }
 0x579   : > { %p1843_p13 = pneg %p1842_p3 }
 0x57b   : > { %p1848_p10 = pnand %p1847_p11, %p1843_p13 }
 0x57d   : > { %1851 = shalt.err (!%p1848_p10)
}
 0x57e   : > { %1609 = dma.vmem_to_hbm [thread:$0]  (%p2068_p12), %s1308_s17, 128, %s1305_s25, %s1293_s26  }
 0x57f PF: > { %s2417_s12 = sld [smem:[#allocation18_spill]] }
 0x580   : > { %s2418_s20 = sld [smem:[#allocation23_spill]] }
 0x581   : > { %s2419_s16 = sld [smem:[#allocation20_spill]] }
 0x585   : > { %s1319_s9 = sand.u32 1, %s2417_s12  }
 0x586   : > { %p2420_p0 = scmp.ne.s32.totalorder %s2418_s20, 0  ;;  %s1320_s27 = scalar_lea.sflag [#allocation7], %s1319_s9 }
 0x587   : > { %p2421_p8 = scmp.ge.s32.totalorder %s2419_s16, 2 }
 0x589   : > { %p1626_p5 = pnand %p2421_p8, %p2420_p0 }
 0x58b   : > { %p1627_p1 = pneg %p1626_p5 }
 0x58d   : > { %1889 = dma.done.wait (%p1627_p1), %s1320_s27, 128  }
 0x58e   : > { %1891 = vsyncadd (%p1627_p1), %s1320_s27, 4294967168  ;;  %s28_s10 = sadd.s32 1, %s2419_s16   ;;  %s2422_s0 = sld [smem:[#allocation22_spill]] }
 0x58f   : > { %p25_p6 = scmp.ge.s32.totalorder %s28_s10, 4   ;;  %s2423_s30 = sld [smem:[#allocation19_spill]] }
 0x590   : > { %s2424_s9 = sld [smem:[#allocation21_spill]]  ;;  %s2425_s27 = smov %s1898_s28 }
 0x591   : > { %s2426_s28 = smov %s1902_s29  ;;  %27 = sbr.rel (!%p25_p6) target bundleno = 12 (0xc), region = 139 }
 0x594   : > { %s2427_s29 = smov %s2422_s0 }
 0x596   :  { %1325 = vsyncpa [#allocation6], 1 }
 0x597   :  { %1327 = vsyncpa [#allocation6 + $0x1], 1 }
 0x598   :  { %1328 = vsyncpa [#allocation9], 1 }
 0x599   :  { %1330 = vsyncpa [#allocation9 + $0x1], 1 }
 0x59a   :  { %1331 = vsyncpa [#allocation12], 1 }
 0x59b   :  { %1332 = vsyncpa [#allocation7], 1 }
 0x59c   :  { %1334 = vsyncpa [#allocation7 + $0x1], 1 }

</bundles_post_ra>
